<compile_context>
chip_gen: v6e
topology: v6e:2x2x1
jax: 0.10.0
libtpu: 0.0.40
codegen_flags: <defaults>
</compile_context>

<pallas_src>
import functools

import jax
import jax.numpy as jnp
from jax.experimental import pallas as pl
from jax.experimental.pallas import tpu as pltpu


def _focal_loss_kernel(x_ref, t_ref, psum_ref, pcnt_ref, acc_s, acc_c,
                       *, gamma, ignore_index):
    """One grid step processes a (C, TILE_R, 128) logits tile of one batch item.

    x_ref    : (C, TILE_R, 128) logits tile (any float dtype)
    t_ref    : (TILE_R, 128)    int32 target class per pixel
    psum_ref : (8, 128) f32 per-batch partial loss sum (written on last r step)
    pcnt_ref : (8, 128) f32 per-batch partial valid-pixel count
    acc_s/acc_c : (8, 128) f32 VMEM scratch accumulators (persist across r)
    """
    r = pl.program_id(1)
    nr = pl.num_programs(1)

    @pl.when(r == 0)
    def _():
        acc_s[...] = jnp.zeros_like(acc_s)
        acc_c[...] = jnp.zeros_like(acc_c)

    x = x_ref[...].astype(jnp.float32)            # (C, TR, 128)
    t = t_ref[...]                                # (TR, 128) int32

    valid = t != ignore_index                     # padded pixels carry ignore_index

    # Numerically stable log-softmax over the class axis (axis 0), evaluated
    # only at the target class.
    m = jnp.max(x, axis=0)                        # (TR, 128)
    sh = x - m[None, :, :]                        # (C, TR, 128)
    denom = jnp.sum(jnp.exp(sh), axis=0)          # (TR, 128)

    cls = jax.lax.broadcasted_iota(jnp.int32, x.shape, 0)           # (C, TR, 128)
    sh_t = jnp.sum(jnp.where(cls == t[None, :, :], sh, 0.0), axis=0)  # (TR, 128)

    logp_t = sh_t - jnp.log(denom)                # log p_t
    p_t = jnp.exp(logp_t)
    q = 1.0 - p_t

    if float(gamma).is_integer() and gamma >= 0:
        # integer gamma -> repeated multiply (pure VPU, no pow / log(0) path)
        w = jnp.ones_like(q)
        for _ in range(int(gamma)):
            w = w * q
    else:
        w = jnp.exp(gamma * jnp.log(jnp.maximum(q, 1e-20)))

    term = jnp.where(valid, -(w * logp_t), 0.0)   # (TR, 128)
    cnt = valid.astype(jnp.float32)

    tr = term.shape[0]                            # TILE_R, multiple of 8
    acc_s[...] += term.reshape(tr // 8, 8, 128).sum(axis=0)
    acc_c[...] += cnt.reshape(tr // 8, 8, 128).sum(axis=0)

    @pl.when(r == nr - 1)
    def _():
        psum_ref[...] = acc_s[...]
        pcnt_ref[...] = acc_c[...]


def focal_loss_2d(inputs_nchw, targets_nhw, *, gamma=2.0, ignore_index=-1):
    """Pallas implementation of FocalLoss2d.forward (returns a scalar).

    NOTE: if every pixel is ignore_index the result is NaN (0/0), matching the
    underlying NLLLoss2d behavior.
    """
    N, C, H, W = inputs_nchw.shape
    S = H * W
    itemsize = jnp.dtype(inputs_nchw.dtype).itemsize

    # Tile the spatial axis as (TILE_R, 128) with ~1 MiB of logits per step.
    target_bytes = 1 << 20
    target_r = (target_bytes // (C * 128 * itemsize)) // 8 * 8
    target_r = max(8, min(2048, target_r))

    R = pl.cdiv(S, 128)                            # 128-lane rows of pixels
    tile_r = min(target_r, ((R + 7) // 8) * 8)     # multiple of 8
    R_pad = ((R + tile_r - 1) // tile_r) * tile_r  # tile_r divides R_pad
    S_pad = R_pad * 128

    x = inputs_nchw.reshape(N, C, S)
    t = targets_nhw.reshape(N, S).astype(jnp.int32)
    if S_pad != S:
        # TODO(synk): the tail could be masked in-kernel (scalar-prefetch the
        # true S) instead of materializing a padded copy; only hit when H*W is
        # not already tile-aligned.
        x = jnp.pad(x, ((0, 0), (0, 0), (0, S_pad - S)))
        t = jnp.pad(t, ((0, 0), (0, S_pad - S)), constant_values=ignore_index)

    x = x.reshape(N, C, R_pad, 128)                # free reshapes, no data movement
    t = t.reshape(N, R_pad, 128)

    grid = (N, R_pad // tile_r)

    kernel = functools.partial(
        _focal_loss_kernel, gamma=float(gamma), ignore_index=int(ignore_index))

    psum, pcnt = pl.pallas_call(
        kernel,
        out_shape=(
            jax.ShapeDtypeStruct((N, 8, 128), jnp.float32),
            jax.ShapeDtypeStruct((N, 8, 128), jnp.float32),
        ),
        grid_spec=pltpu.PrefetchScalarGridSpec(
            num_scalar_prefetch=0,
            grid=grid,
            in_specs=[
                pl.BlockSpec((None, C, tile_r, 128), lambda b, r: (b, 0, r, 0)),
                pl.BlockSpec((None, tile_r, 128), lambda b, r: (b, r, 0)),
            ],
            out_specs=[
                pl.BlockSpec((None, 8, 128), lambda b, r: (b, 0, 0)),
                pl.BlockSpec((None, 8, 128), lambda b, r: (b, 0, 0)),
            ],
            scratch_shapes=[
                pltpu.VMEM((8, 128), jnp.float32),
                pltpu.VMEM((8, 128), jnp.float32),
            ],
        ),
        compiler_params=pltpu.CompilerParams(
            dimension_semantics=("parallel", "arbitrary")),
    )(x, t)

    # NLLLoss2d(weight=None, size_average=True): mean over non-ignored pixels.
    return jnp.sum(psum) / jnp.sum(pcnt)


if __name__ == "__main__":
    key = jax.random.PRNGKey(0)
    k_logits, k_targets, k_ignore = jax.random.split(key, 3)

    N, C, H, W = 2, 4, 16, 16
    logits = jax.random.normal(k_logits, (N, C, H, W), dtype=jnp.float32)
    targets = jax.random.randint(k_targets, (N, H, W), 0, C, dtype=jnp.int32)
    # sprinkle a few ignore_index pixels to exercise masking
    ignore_mask = jax.random.bernoulli(k_ignore, p=0.1, shape=(N, H, W))
    targets = jnp.where(ignore_mask, -1, targets)

    loss = focal_loss_2d(logits, targets, gamma=2.0, ignore_index=-1)
    loss = jax.block_until_ready(loss)

    # pure-JAX reference for a sanity check
    def ref(logits, targets, gamma=2.0, ignore_index=-1):
        logp = jax.nn.log_softmax(logits, axis=1)
        p = jax.nn.softmax(logits, axis=1)
        focal = (1.0 - p) ** gamma * logp                       # (N,C,H,W)
        safe_t = jnp.where(targets == ignore_index, 0, targets)
        picked = jnp.take_along_axis(focal, safe_t[:, None], axis=1)[:, 0]
        valid = (targets != ignore_index).astype(jnp.float32)
        return jnp.sum(-picked * valid) / jnp.sum(valid)

    ref_loss = ref(logits, targets)
    assert jnp.allclose(loss, ref_loss, rtol=1e-5, atol=1e-5), (loss, ref_loss)

    print("KERNEL_OK")
</pallas_src>

<mosaic_0001>
module attributes {stable_mosaic.version = 11 : i64} {
  func.func @_focal_loss_kernel(%arg0: i32, %arg1: i32, %arg2: memref<1x4x8x128xf32, #tpu.memory_space<vmem>>, %arg3: memref<1x8x128xi32, #tpu.memory_space<vmem>>, %arg4: memref<1x8x128xf32, #tpu.memory_space<vmem>>, %arg5: memref<1x8x128xf32, #tpu.memory_space<vmem>>, %arg6: memref<8x128xf32, #tpu.memory_space<vmem>>, %arg7: memref<8x128xf32, #tpu.memory_space<vmem>>) attributes {dimension_semantics = [#tpu.dimension_semantics<parallel>, #tpu.dimension_semantics<arbitrary>], iteration_bounds = array<i64: 2, 1>, scalar_prefetch = 0 : i64, scratch_operands = 2 : i64, tpu.core_type = #tpu.core_type<tc>, window_params = [{transform_indices = @transform_0, window_bounds = array<i64: 1, 4, 8, 128>}, {transform_indices = @transform_1, window_bounds = array<i64: 1, 8, 128>}, {transform_indices = @transform_2, window_bounds = array<i64: 1, 8, 128>}, {transform_indices = @transform_3, window_bounds = array<i64: 1, 8, 128>}]} {
    %c0_i32 = arith.constant 0 : i32
    %0 = arith.cmpi eq, %arg1, %c0_i32 : i32
    %1 = arith.extui %0 : i1 to i32
    %c0_i32_0 = arith.constant 0 : i32
    %2 = arith.cmpi ne, %1, %c0_i32_0 : i32
    scf.if %2 {
      %cst_26 = arith.constant 0.000000e+00 : f32
      %50 = vector.broadcast %cst_26 : f32 to vector<8x128xf32>
      %c0_27 = arith.constant 0 : index
      %c0_28 = arith.constant 0 : index
      %51 = vector.load %arg6[%c0_27, %c0_28] : memref<8x128xf32, #tpu.memory_space<vmem>>, vector<8x128xf32>
      tpu.vector_store %arg6[%c0_27, %c0_28], %50 {strides = array<i32>} : memref<8x128xf32, #tpu.memory_space<vmem>>, vector<8x128xf32>,
      %cst_29 = arith.constant 0.000000e+00 : f32
      %52 = vector.broadcast %cst_29 : f32 to vector<8x128xf32>
      %c0_30 = arith.constant 0 : index
      %c0_31 = arith.constant 0 : index
      %53 = vector.load %arg7[%c0_30, %c0_31] : memref<8x128xf32, #tpu.memory_space<vmem>>, vector<8x128xf32>
      tpu.vector_store %arg7[%c0_30, %c0_31], %52 {strides = array<i32>} : memref<8x128xf32, #tpu.memory_space<vmem>>, vector<8x128xf32>,
    } else {
    }
    %c0 = arith.constant 0 : index
    %c0_1 = arith.constant 0 : index
    %c0_2 = arith.constant 0 : index
    %c0_3 = arith.constant 0 : index
    %3 = vector.load %arg2[%c0, %c0_1, %c0_2, %c0_3] : memref<1x4x8x128xf32, #tpu.memory_space<vmem>>, vector<1x4x8x128xf32>
    %4 = vector.shape_cast %3 : vector<1x4x8x128xf32> to vector<4x8x128xf32>
    %c0_4 = arith.constant 0 : index
    %c0_5 = arith.constant 0 : index
    %c0_6 = arith.constant 0 : index
    %5 = vector.load %arg3[%c0_4, %c0_5, %c0_6] : memref<1x8x128xi32, #tpu.memory_space<vmem>>, vector<1x8x128xi32>
    %6 = vector.shape_cast %5 : vector<1x8x128xi32> to vector<8x128xi32>
    %c-1_i32 = arith.constant -1 : i32
    %7 = vector.broadcast %c-1_i32 : i32 to vector<8x128xi32>
    %8 = arith.cmpi ne, %6, %7 : vector<8x128xi32>
    %cst = arith.constant dense<0xFF800000> : vector<8x128xf32>
    %9 = vector.multi_reduction <maximumf>, %4, %cst [0] : vector<4x8x128xf32> to vector<8x128xf32>
    %10 = vector.shape_cast %9 : vector<8x128xf32> to vector<1x8x128xf32>
    %11 = vector.broadcast %10 : vector<1x8x128xf32> to vector<4x8x128xf32>
    %12 = arith.subf %4, %11 : vector<4x8x128xf32>
    %13 = math.exp %12 : vector<4x8x128xf32>
    %cst_7 = arith.constant dense<0.000000e+00> : vector<8x128xf32>
    %14 = vector.multi_reduction <add>, %13, %cst_7 [0] : vector<4x8x128xf32> to vector<8x128xf32>
    %15 = tpu.iota {dimensions = array<i32: 0>} : vector<4x8x128xi32>
    %16 = vector.shape_cast %6 : vector<8x128xi32> to vector<1x8x128xi32>
    %17 = vector.broadcast %16 : vector<1x8x128xi32> to vector<4x8x128xi32>
    %18 = arith.cmpi eq, %15, %17 : vector<4x8x128xi32>
    %cst_8 = arith.constant 0.000000e+00 : f32
    %19 = vector.broadcast %cst_8 : f32 to vector<4x8x128xf32>
    %20 = arith.select %18, %12, %19 : vector<4x8x128xi1>, vector<4x8x128xf32>
    %cst_9 = arith.constant dense<0.000000e+00> : vector<8x128xf32>
    %21 = vector.multi_reduction <add>, %20, %cst_9 [0] : vector<4x8x128xf32> to vector<8x128xf32>
    %22 = math.log %14 : vector<8x128xf32>
    %23 = arith.subf %21, %22 : vector<8x128xf32>
    %24 = math.exp %23 : vector<8x128xf32>
    %cst_10 = arith.constant 1.000000e+00 : f32
    %25 = vector.broadcast %cst_10 : f32 to vector<8x128xf32>
    %26 = arith.subf %25, %24 : vector<8x128xf32>
    %cst_11 = arith.constant 1.000000e+00 : f32
    %27 = vector.broadcast %cst_11 : f32 to vector<8x128xf32>
    %28 = arith.mulf %27, %26 : vector<8x128xf32>
    %29 = arith.mulf %28, %26 : vector<8x128xf32>
    %30 = arith.mulf %29, %23 : vector<8x128xf32>
    %cst_12 = arith.constant 0.000000e+00 : f32
    %31 = vector.broadcast %cst_12 : f32 to vector<8x128xf32>
    %32 = arith.subf %31, %30 : vector<8x128xf32>
    %cst_13 = arith.constant 0.000000e+00 : f32
    %33 = vector.broadcast %cst_13 : f32 to vector<8x128xf32>
    %34 = arith.select %8, %32, %33 : vector<8x128xi1>, vector<8x128xf32>
    %35 = arith.extui %8 : vector<8x128xi1> to vector<8x128xi32>
    %36 = arith.sitofp %35 : vector<8x128xi32> to vector<8x128xf32>
    %c0_14 = arith.constant 0 : index
    %c0_15 = arith.constant 0 : index
    %37 = vector.load %arg6[%c0_14, %c0_15] : memref<8x128xf32, #tpu.memory_space<vmem>>, vector<8x128xf32>
    %38 = vector.shape_cast %34 : vector<8x128xf32> to vector<1x8x128xf32>
    %cst_16 = arith.constant dense<0.000000e+00> : vector<8x128xf32>
    %39 = vector.multi_reduction <add>, %38, %cst_16 [0] : vector<1x8x128xf32> to vector<8x128xf32>
    %40 = arith.addf %37, %39 : vector<8x128xf32>
    %c0_17 = arith.constant 0 : index
    %c0_18 = arith.constant 0 : index
    %41 = vector.load %arg6[%c0_17, %c0_18] : memref<8x128xf32, #tpu.memory_space<vmem>>, vector<8x128xf32>
    tpu.vector_store %arg6[%c0_17, %c0_18], %40 {strides = array<i32>} : memref<8x128xf32, #tpu.memory_space<vmem>>, vector<8x128xf32>,
    %c0_19 = arith.constant 0 : index
    %c0_20 = arith.constant 0 : index
    %42 = vector.load %arg7[%c0_19, %c0_20] : memref<8x128xf32, #tpu.memory_space<vmem>>, vector<8x128xf32>
    %43 = vector.shape_cast %36 : vector<8x128xf32> to vector<1x8x128xf32>
    %cst_21 = arith.constant dense<0.000000e+00> : vector<8x128xf32>
    %44 = vector.multi_reduction <add>, %43, %cst_21 [0] : vector<1x8x128xf32> to vector<8x128xf32>
    %45 = arith.addf %42, %44 : vector<8x128xf32>
    %c0_22 = arith.constant 0 : index
    %c0_23 = arith.constant 0 : index
    %46 = vector.load %arg7[%c0_22, %c0_23] : memref<8x128xf32, #tpu.memory_space<vmem>>, vector<8x128xf32>
    tpu.vector_store %arg7[%c0_22, %c0_23], %45 {strides = array<i32>} : memref<8x128xf32, #tpu.memory_space<vmem>>, vector<8x128xf32>,
    %c0_i32_24 = arith.constant 0 : i32
    %47 = arith.cmpi eq, %arg1, %c0_i32_24 : i32
    %48 = arith.extui %47 : i1 to i32
    %c0_i32_25 = arith.constant 0 : i32
    %49 = arith.cmpi ne, %48, %c0_i32_25 : i32
    scf.if %49 {
      %c0_26 = arith.constant 0 : index
      %c0_27 = arith.constant 0 : index
      %50 = vector.load %arg6[%c0_26, %c0_27] : memref<8x128xf32, #tpu.memory_space<vmem>>, vector<8x128xf32>
      %c0_28 = arith.constant 0 : index
      %c0_29 = arith.constant 0 : index
      %c0_30 = arith.constant 0 : index
      %51 = vector.load %arg4[%c0_28, %c0_29, %c0_30] : memref<1x8x128xf32, #tpu.memory_space<vmem>>, vector<1x8x128xf32>
      %52 = vector.shape_cast %51 : vector<1x8x128xf32> to vector<8x128xf32>
      %53 = vector.shape_cast %50 : vector<8x128xf32> to vector<1x8x128xf32>
      tpu.vector_store %arg4[%c0_28, %c0_29, %c0_30], %53 {strides = array<i32>} : memref<1x8x128xf32, #tpu.memory_space<vmem>>, vector<1x8x128xf32>,
      %c0_31 = arith.constant 0 : index
      %c0_32 = arith.constant 0 : index
      %54 = vector.load %arg7[%c0_31, %c0_32] : memref<8x128xf32, #tpu.memory_space<vmem>>, vector<8x128xf32>
      %c0_33 = arith.constant 0 : index
      %c0_34 = arith.constant 0 : index
      %c0_35 = arith.constant 0 : index
      %55 = vector.load %arg5[%c0_33, %c0_34, %c0_35] : memref<1x8x128xf32, #tpu.memory_space<vmem>>, vector<1x8x128xf32>
      %56 = vector.shape_cast %55 : vector<1x8x128xf32> to vector<8x128xf32>
      %57 = vector.shape_cast %54 : vector<8x128xf32> to vector<1x8x128xf32>
      tpu.vector_store %arg5[%c0_33, %c0_34, %c0_35], %57 {strides = array<i32>} : memref<1x8x128xf32, #tpu.memory_space<vmem>>, vector<1x8x128xf32>,
    } else {
    }
    return
  }
  func.func @transform_0(%arg0: i32, %arg1: i32) -> (i32, i32, i32, i32) {
    %c0_i32 = arith.constant 0 : i32
    %c0_i32_0 = arith.constant 0 : i32
    %c0_i32_1 = arith.constant 0 : i32
    return %arg0, %c0_i32, %arg1, %c0_i32_0 : i32, i32, i32, i32
  }
  func.func @transform_1(%arg0: i32, %arg1: i32) -> (i32, i32, i32) {
    %c0_i32 = arith.constant 0 : i32
    %c0_i32_0 = arith.constant 0 : i32
    return %arg0, %arg1, %c0_i32 : i32, i32, i32
  }
  func.func @transform_2(%arg0: i32, %arg1: i32) -> (i32, i32, i32) {
    %c0_i32 = arith.constant 0 : i32
    %c0_i32_0 = arith.constant 0 : i32
    %c0_i32_1 = arith.constant 0 : i32
    return %arg0, %c0_i32, %c0_i32_0 : i32, i32, i32
  }
  func.func @transform_3(%arg0: i32, %arg1: i32) -> (i32, i32, i32) {
    %c0_i32 = arith.constant 0 : i32
    %c0_i32_0 = arith.constant 0 : i32
    %c0_i32_1 = arith.constant 0 : i32
    return %arg0, %c0_i32, %c0_i32_0 : i32, i32, i32
  }
}

</mosaic_0001>

<bundles_post_ra>
// kernel: tpu_custom_call.1
= control target key start
LH: loop header
LB: loop body
LE: loop exit
PB: predicated region body
PF: predicated region fallthrough
CT: control target
= control target key end

     0   :  { %s1015_s0 = inlined_call_operand.hbm [shape: f32[2,4,8,128], index: 0, kind: input, shape index: {}]   ;;  %s1016_s1 = inlined_call_operand.hbm [shape: s32[2,8,128], index: 1, kind: input, shape index: {}]   ;;  %s1017_s2 = inlined_call_operand.hbm [shape: f32[2,8,128], index: 2, kind: output, shape index: {0}]   ;;  %s1018_s3 = inlined_call_operand.hbm [shape: f32[2,8,128], index: 3, kind: output, shape index: {1}]  }
   0x1   :  { %1019 = sst [smem:[#allocation16_spill]] %s1015_s0 }
   0x2   :  { %9 = vsyncpa [#allocation5], 0 }
   0x3   :  { %11 = vsyncpa [#allocation5 + $0x1], 0 }
   0x4   :  { %12 = vsyncpa [#allocation8], 0 }
   0x5   :  { %14 = vsyncpa [#allocation8 + $0x1], 0 }
   0x6   :  { %15 = vsyncpa [#allocation6], 0 }
   0x7   :  { %17 = vsyncpa [#allocation6 + $0x1], 0 }
   0x8   :  { %18 = vsyncpa [#allocation11], 0 }
   0x9   :  { %20 = vsyncpa [#allocation11 + $0x1], 0  ;;  %s799_s12 = smov 0   ;;  %s801_s13 = smov 0  }
   0xa   :  { %s803_s14 = smov 0   ;;  %s805_s15 = smov 0  }
   0xb   :  { %s807_s16 = smov 0   ;;  %s809_s17 = smov 0  }
   0xc LB: > { %s491_s18 = sadd.s32 4294967295, %s770_s17   ;;  %s492_s19 = sadd.s32 4294967294, %s770_s17   ;;  %s770_s17 = sphi %s809_s17, %s26_s17   ;;  %s766_s16 = sphi %s807_s16, %s1032_s16   ;;  %s762_s15 = sphi %s805_s15, %s1031_s15   ;;  %s758_s14 = sphi %s803_s14, %s1030_s14   ;;  %s754_s13 = sphi %s801_s13, %s1029_s13   ;;  %s750_s12 = sphi %s799_s12, %s1028_s12  }
   0xd   : > { %s38_s20 = sadd.s32 1, %s766_s16  ;;  %s47_s21 = sadd.s32 1, %s758_s14 }
   0xe   : > { %p40_p0 = scmp.ge.s32.totalorder %s38_s20, 2  ;;  %p54_p1 = scmp.ne.s32.totalorder %s758_s14, %s754_s13 }
   0xf   : > { %p55_p2 = scmp.eq.s32.totalorder %s770_s17, 0  ;;  %p60_p3 = scmp.ne.s32.totalorder %s754_s13, %s750_s12 }
  0x10   : > { %s1034_s20 = smov (%p40_p0, %s38_s20), 0  ;;  %p61_p5 = scmp.eq.s32.totalorder %s491_s18, 0 }
  0x11   : > { %p840_p4 = por %p55_p2, %p54_p1  ;;  %s42_s23 = ssub.s32 %s766_s16, %s1034_s20 }
  0x12   : > { %p112_p6 = scmp.eq.s32.totalorder %s491_s18, 1  ;;  %p45_p7 = scmp.eq.s32.totalorder %s42_s23, 0 }
  0x13   : > { %p846_p8 = por %p61_p5, %p60_p3  ;;  %p118_p10 = scmp.eq.s32.totalorder %s492_s19, 1 }
  0x14   : > { %p850_p9 = por %p112_p6, %p54_p1  ;;  %p535_p13 = scmp.lt.s32.totalorder %s770_s17, 2 }
  0x15   : > { %s855_s26 = scalar_select %p45_p7, %s758_s14, %s47_s21  }
  0x16   : > { %p857_p11 = por %p118_p10, %p60_p3  ;;  %s864_s28 = sand.u32 1, %s758_s14  }
  0x17   : > { %s495_s29 = sshll.u32 %s864_s28, 5  ;;  %s512_s30 = sshll.u32 %s766_s16, 9 }
  0x18   : > { %s1024_s0 = sld [smem:[#allocation16_spill]]  ;;  %s168_s7 = scalar_lea.vmem [#allocation4], %s495_s29 }
  0x19   : > { %s176_s8 = sshll.u32 %s168_s7, 4  ;;  %p873_p0 = pnand %p535_p13, %p840_p4  ;;  %s177_s8 = int_to_ptr.vmem [resolvable:$true] %s176_s8 }
  0x1a   : > { %p500_p1 = scmp.ge.s32.totalorder %s770_s17, 1  ;;  %s165_s10 = scalar_lea.sflag [#allocation5], %s864_s28 }
  0x1b   : > { %p602_p2 = pneg %p873_p0  ;;  %s613_s11 = scalar_lea.vmem %s177_s8, 512 }
  0x1c   : > { %p614_p3 = scmp.ne.s32.totalorder %s177_s8, %s613_s11  ;;  %s772_s18 = smov [#allocation4]  }
  0x1d   : > { %s618_s19 = sshll.u32 %s772_s18, 4  ;;  %s619_s19 = int_to_ptr.vmem [resolvable:$false] %s618_s19 }
  0x1e   : > { %s175_s6 = scalar_lea.hbm %s1024_s0, %s512_s30  ;;  %p616_p5 = pnand %p614_p3, %p602_p2 }
  0x1f   : > { %s620_s21 = scalar_lea.vmem %s619_s19, 1024  ;;  %p621_p4 = scmp.lt.s32.totalorder %s177_s8, %s619_s19 }
  0x20   : > { %p617_p6 = pneg %p616_p5  ;;  %p622_p7 = scmp.lt.s32.totalorder %s620_s21, %s613_s11 }
  0x22   : > { %p623_p10 = por %p622_p7, %p621_p4 }
  0x24   : > { %p624_p13 = pnand %p623_p10, %p617_p6 }
  0x26   : > { %627 = shalt.err (!%p624_p13)
}
  0x27   : > { %s773_s22 = smov 128   ;;  %s774_s23 = smov 8  }
  0x28   : > { %524 = dma.hbm_to_vmem [thread:$0]  (!%p873_p0), %s175_s6, 512, %s177_s8, %s165_s10, %s773_s22, %s773_s22, %s774_s23  }
  0x29   : > { %p203_p3 = scmp.lt.s32.totalorder %s770_s17, 3  ;;  %s498_s29 = sshll.u32 %s864_s28, 3 }
  0x2a   : > { %s499_s30 = sshll.u32 %s766_s16, 7  ;;  %s190_s18 = scalar_lea.vmem [#allocation7], %s498_s29 }
  0x2b   : > { %p891_p5 = pnand %p500_p1, %p203_p3  ;;  %s196_s11 = scalar_lea.hbm %s1016_s1, %s499_s30 }
  0x2c   : > { %s198_s19 = sshll.u32 %s190_s18, 4  ;;  %s187_s21 = scalar_lea.sflag [#allocation8], %s864_s28  ;;  %s199_s19 = int_to_ptr.vmem [resolvable:$true] %s198_s19 }
  0x2d   : > { %s641_s0 = scalar_lea.vmem %s199_s19, 128  ;;  %s775_s6 = smov [#allocation7]  }
  0x2e   : > { %p642_p6 = scmp.ne.s32.totalorder %s199_s19, %s641_s0  ;;  %s646_s8 = sshll.u32 %s775_s6, 4  ;;  %s647_s8 = int_to_ptr.vmem [resolvable:$false] %s646_s8 }
  0x2f   : > { %s648_s10 = scalar_lea.vmem %s647_s8, 256  ;;  %p649_p1 = scmp.lt.s32.totalorder %s199_s19, %s647_s8 }
  0x30   : > { %p644_p4 = pnand %p642_p6, %p602_p2  ;;  %p650_p10 = scmp.lt.s32.totalorder %s648_s10, %s641_s0 }
  0x32   : > { %p645_p7 = pneg %p644_p4  ;;  %p651_p13 = por %p650_p10, %p649_p1 }
  0x34   : > { %p652_p3 = pnand %p651_p13, %p645_p7 }
  0x36   : > { %655 = shalt.err (!%p652_p3)
}
  0x37   : > { %527 = dma.hbm_to_vmem [thread:$0]  (!%p873_p0), %s196_s11, 128, %s199_s19, %s187_s21  }
  0x38   : > { %207 = sbr.rel (%p891_p5) target bundleno = 169 (0xa9), region = 28  ;;  %s907_s28 = sand.u32 (!%p891_p5), 1, %s754_s13  }
  0x39   : > { %s501_s22 = sshll.u32 (!%p891_p5), %s907_s28, 5  ;;  %s210_s23 = scalar_lea.sflag (!%p891_p5), [#allocation5], %s907_s28 }
  0x3a   : > { %s213_s29 = scalar_lea.vmem (!%p891_p5), [#allocation4], %s501_s22 }
  0x3d   : > { %733 = dma.done.wait (%p846_p8), %s210_s23, 512  }
  0x3e   : > { %735 = vsyncadd (%p846_p8), %s210_s23, 4294966784  ;;  %s916_s0 = sshll.u32 %s907_s28, 3  ;;  %s219_s9 = scalar_lea.sflag [#allocation8], %s907_s28 }
  0x3f   : > { %s222_s30 = scalar_lea.vmem [#allocation7], %s916_s0 }
  0x40   : > { %737 = dma.done.wait (%p846_p8), %s219_s9, 128  }
  0x41   : > { %739 = vsyncadd (%p846_p8), %s219_s9, 4294967168  ;;  %s254_s4 = scalar_lea.vmem [#allocation10], %s916_s0  ;;  %s508_s7 = sshll.u32 %s762_s15, 7  ;;  %v261_v0 = vld [vmem:[%s213_s29] sm:$0xff]  ;;  %v262_v1 = vld [vmem:[%s213_s29 + $0x8] sm:$0xff]  ;;  %v776_v7 = vmov 0.0  }
  0x42   : > { %s355_s5 = sshll.u32 %s254_s4, 4  ;;  %v263_v2 = vld [vmem:[%s213_s29 + $0x10] sm:$0xff]  ;;  %v264_v3 = vld [vmem:[%s213_s29 + $0x18] sm:$0xff]  ;;  %v926_v4 = vld [vmem:[%s222_s30] sm:$0xff]  ;;  %v267_v5 = vmax.f32 %v261_v0, %v262_v1  ;;  %s936_s18 = scalar_lea.hbm %s1018_s3, %s508_s7  ;;  %s928_s5 = int_to_ptr.vmem [resolvable:$true] %s355_s5 }
  0x43   : > { %vm266_vm0 = vcmp.ne.s32.totalorder %v926_v4, 4294967295  ;;  %v268_v6 = vmax.f32 %v263_v2, %v264_v3  ;;  %s329_s19 = scalar_lea.sflag [#allocation11], %s907_s28  ;;  %s656_s21 = scalar_lea.vmem %s928_s5, 128 }
  0x44   : > { %v505_v8 = vsel %vm266_vm0, 1.0, %v776_v7  ;;  %p657_p8 = scmp.ne.s32.totalorder %s928_s5, %s656_s21  ;;  %s777_s6 = smov [#allocation10]  }
  0x45   : > { %v269_v9 = vmax.f32 %v267_v5, %v268_v6  ;;  %322 = vst [vmem:[%s254_s4] sm:$0xff] %v505_v8  ;;  %s660_s8 = sshll.u32 %s777_s6, 4  ;;  %s661_s8 = int_to_ptr.vmem [resolvable:$false] %s660_s8 }
  0x46   : > { %p658_p0 = pnand %p657_p8, %p850_p9  ;;  %s662_s10 = scalar_lea.vmem %s661_s8, 256 }
  0x47   : > { %p663_p5 = scmp.lt.s32.totalorder %s928_s5, %s661_s8  ;;  %p664_p6 = scmp.lt.s32.totalorder %s662_s10, %s656_s21 }
  0x48   : > { %p659_p2 = pneg %p658_p0 }
  0x49   : > { %p665_p4 = por %p664_p6, %p663_p5 }
  0x4b   : > { %p666_p7 = pnand %p665_p4, %p659_p2 }
  0x4d   : > { %669 = shalt.err (!%p666_p7)
}
  0x4e   : > { %s670_s22 = scalar_lea.hbm %s936_s18, 128  ;;  %s674_s9 = scalar_lea.hbm %s1018_s3, 256 }
  0x4f   : > { %p671_p1 = scmp.ne.s32.totalorder %s936_s18, %s670_s22  ;;  %p675_p3 = scmp.lt.s32.totalorder %s936_s18, %s1018_s3 }
  0x50   : > { %p676_p8 = scmp.lt.s32.totalorder %s674_s9, %s670_s22 }
  0x51   : > { %p672_p10 = pnand %p671_p1, %p850_p9 }
  0x52   : > { %p677_p0 = por %p676_p8, %p675_p3 }
  0x53   : > { %p673_p13 = pneg %p672_p10 }
  0x55   : > { %p678_p2 = pnand %p677_p0, %p673_p13 }
  0x57   : > { %681 = shalt.err (!%p678_p2)
}
  0x58   : > { %518 = dma.vmem_to_hbm [thread:$0]  (%p850_p9), %s928_s5, 128, %s936_s18, %s329_s19   ;;  %v270_v10 = vsub.f32 %v261_v0, %v269_v9  ;;  %v271_v11 = vsub.f32 %v262_v1, %v269_v9  ;;  %v272_v12 = vsub.f32 %v263_v2, %v269_v9  ;;  %v273_v13 = vsub.f32 %v264_v3, %v269_v9 }
  0x59   : > { %vm285_vm1 = vcmp.eq.s32.totalorder %v926_v4, 0  ;;  %vm286_vm2 = vcmp.eq.s32.totalorder %v926_v4, 1  ;;  %vm287_vm3 = vcmp.eq.s32.totalorder %v926_v4, 2  ;;  %vm288_vm4 = vcmp.eq.s32.totalorder %v926_v4, 3  ;;  %s247_s5 = scalar_lea.vmem [#allocation9], %s916_s0  ;;  %s340_s19 = scalar_lea.hbm %s1017_s2, %s508_s7 }
  0x5a   : > { %v274_v14 = vmul.f32 1.442695, %v270_v10  ;;  %v276_v15 = vmul.f32 1.442695, %v271_v11  ;;  %v278_v16 = vmul.f32 1.442695, %v272_v12 }
  0x5b   : > { %v280_v17 = vmul.f32 1.442695, %v273_v13  ;;  %v289_v25 = vsel %vm285_vm1, %v270_v10, 0.0  ;;  %v290_v26 = vsel %vm286_vm2, %v271_v11, 0.0  ;;  %v291_v28 = vsel %vm287_vm3, %v272_v12, 0.0  ;;  %s342_s24 = sshll.u32 %s247_s5, 4  ;;  %s966_s24 = int_to_ptr.vmem [resolvable:$true] %s342_s24 }
  0x5c   : > { %588 = vpow2.f32 %v274_v14  ;;  %v293_v27 = vadd.f32 %v290_v26, %v289_v25  ;;  %v292_v30 = vsel %vm288_vm4, %v273_v13, 0.0  ;;  %s324_s21 = scalar_lea.sflag [#allocation6], %s907_s28  ;;  %s682_s6 = scalar_lea.vmem %s966_s24, 128 }
  0x5d   : > { %590 = vpow2.f32 %v276_v15  ;;  %p683_p5 = scmp.ne.s32.totalorder %s966_s24, %s682_s6  ;;  %s778_s0 = smov [#allocation9]  }
  0x5e   : > { %592 = vpow2.f32 %v278_v16  ;;  %v294_v29 = vadd.f32 %v293_v27, %v291_v28  ;;  %s686_s8 = sshll.u32 %s778_s0, 4  ;;  %s687_s8 = int_to_ptr.vmem [resolvable:$false] %s686_s8 }
  0x5f   : > { %594 = vpow2.f32 %v280_v17  ;;  %p684_p6 = pnand %p683_p5, %p850_p9  ;;  %s688_s15 = scalar_lea.vmem %s687_s8, 256 }
  0x60   : > { %v295_v31 = vadd.f32 %v294_v29, %v292_v30  ;;  %p689_p7 = scmp.lt.s32.totalorder %s966_s24, %s687_s8  ;;  %p690_p1 = scmp.lt.s32.totalorder %s688_s15, %s682_s6 }
  0x61   : > { %p685_p4 = pneg %p684_p6 }
  0x62   : > { %p691_p10 = por %p690_p1, %p689_p7 }
  0x64   : > { %p692_p13 = pnand %p691_p10, %p685_p4 }
  0x69   : > { %v589_v18 = vpop.eup %588 }
  0x6a   : > { %v591_v19 = vpop.eup %590 }
  0x6b   : > { %v593_v20 = vpop.eup %592  ;;  %v282_v21 = vadd.f32 %v591_v19, %v589_v18 }
  0x6c   : > { %v595_v22 = vpop.eup %594 }
  0x6d   : > { %v283_v23 = vadd.f32 %v593_v20, %v282_v21 }
  0x6f   : > { %v284_v24 = vadd.f32 %v595_v22, %v283_v23 }
  0x71   : > { %596 = vlog2.f32 %v284_v24 }
  0x7e   : > { %v597_v32 = vpop.eup %596 }
  0x7f   : > { %v297_v33 = vmul.f32 0.6931472, %v597_v32 }
  0x81   : > { %v298_v34 = vsub.f32 %v295_v31, %v297_v33 }
  0x83   : > { %v299_v35 = vmul.f32 1.442695, %v298_v34 }
  0x85   : > { %598 = vpow2.f32 %v299_v35 }
  0x92   : > { %v599_v36 = vpop.eup %598 }
  0x93   : > { %v301_v37 = vsub.f32 1.0, %v599_v36 }
  0x95   : > { %v302_v38 = vmul.f32 %v301_v37, %v301_v37 }
  0x97   : > { %v303_v39 = vmul.f32 %v302_v38, %v298_v34 }
  0x99   : > { %v304_v40 = vsub.f32 0.0, %v303_v39 }
  0x9b   : > { %v305_v41 = vsel %vm266_vm0, %v304_v40, 0.0 }
  0x9c   : > { %320 = vst [vmem:[%s247_s5] sm:$0xff] %v305_v41 }
  0x9d   : > { %695 = shalt.err (!%p692_p13)
}
  0x9e   : > { %s696_s7 = scalar_lea.hbm %s340_s19, 128  ;;  %s700_s22 = scalar_lea.hbm %s1017_s2, 256 }
  0x9f   : > { %p697_p3 = scmp.ne.s32.totalorder %s340_s19, %s696_s7  ;;  %p701_p2 = scmp.lt.s32.totalorder %s340_s19, %s1017_s2 }
  0xa0   : > { %p702_p5 = scmp.lt.s32.totalorder %s700_s22, %s696_s7 }
  0xa1   : > { %p698_p8 = pnand %p697_p3, %p850_p9 }
  0xa2   : > { %p703_p6 = por %p702_p5, %p701_p2 }
  0xa3   : > { %p699_p0 = pneg %p698_p8 }
  0xa5   : > { %p704_p12 = pnand %p703_p6, %p699_p0 }
  0xa7   : > { %707 = shalt.err (!%p704_p12)
}
  0xa8   : > { %517 = dma.vmem_to_hbm [thread:$0]  (%p850_p9), %s966_s24, 128, %s340_s19, %s324_s21  }
  0xa9 PF: > { %s367_s9 = sand.u32 1, %s750_s12   ;;  %p1027_p4 = scmp.ge.s32.totalorder %s770_s17, 2 }
  0xaa   : > { %s368_s30 = scalar_lea.sflag [#allocation6], %s367_s9 }
  0xab   : > { %p529_p7 = pnand %p1027_p4, %p857_p11 }
  0xad   : > { %p530_p1 = pneg %p529_p7 }
  0xaf   : > { %741 = dma.done.wait (%p530_p1), %s368_s30, 128  }
  0xb0   : > { %743 = vsyncadd (%p530_p1), %s368_s30, 4294967168  ;;  %s377_s4 = scalar_lea.sflag [#allocation11], %s367_s9 }
  0xb1   : > { %745 = dma.done.wait (%p530_p1), %s377_s4, 128  }
  0xb2   : > { %747 = vsyncadd (%p530_p1), %s377_s4, 4294967168  ;;  %s26_s17 = sadd.s32 1, %s770_s17   ;;  %s1028_s12 = smov %s754_s13 }
  0xb3   : > { %p23_p12 = scmp.ge.s32.totalorder %s26_s17, 4   ;;  %s1029_s13 = smov %s758_s14 }
  0xb4   : > { %s1030_s14 = smov %s855_s26  ;;  %s1031_s15 = smov %s766_s16 }
  0xb5   : > { %s1032_s16 = smov %s1034_s20  ;;  %25 = sbr.rel (!%p23_p12) target bundleno = 12 (0xc), region = 111 }
  0xba   :  { %382 = vsyncpa [#allocation5], 1 }
  0xbb   :  { %384 = vsyncpa [#allocation5 + $0x1], 1 }
  0xbc   :  { %385 = vsyncpa [#allocation8], 1 }
  0xbd   :  { %387 = vsyncpa [#allocation8 + $0x1], 1 }
  0xbe   :  { %388 = vsyncpa [#allocation6], 1 }
  0xbf   :  { %390 = vsyncpa [#allocation6 + $0x1], 1 }
  0xc0   :  { %391 = vsyncpa [#allocation11], 1 }
  0xc1   :  { %393 = vsyncpa [#allocation11 + $0x1], 1 }

</bundles_post_ra>
